<compile_context>
chip_gen: v7x
topology: tpu7x:2x2x1
jax: 0.10.0
libtpu: 0.0.40
codegen_flags: <defaults>
</compile_context>

<pallas_src>
import functools

import jax
import jax.numpy as jnp
from jax.experimental import pallas as pl
from jax.experimental.pallas import tpu as pltpu


def _shift_kernel(shift_ref, x_ref, o_ref, *, pad, images_per_step):
    # shift_ref: SMEM (2*N,) int32 scalar-prefetch, [sx0, sy0, sx1, sy1, ...]
    #            (flat 1-D layout: a 2-D (N, 2) SMEM buffer would pad to
    #             (ceil(N/8)*8, 128) words — ~64x SMEM blowup).
    # x_ref    : VMEM (G, C, H, W) input slab, native dtype.
    # o_ref    : VMEM (G, C, H, W) float32 output slab.
    G = images_per_step
    _, C, H, W = x_ref.shape
    step = pl.program_id(0)

    for g in range(G):                      # static unroll; G is small
        idx = step * G + g
        sx = shift_ref[2 * idx]             # width shift  in [0, 2*pad]
        sy = shift_ref[2 * idx + 1]         # height shift in [0, 2*pad]
        dx = sx - pad
        dy = sy - pad

        # One-hot selection matrices, built once per IMAGE (not per channel),
        # each from a single broadcast-compare.
        #   PcolT[k, j] = 1 iff k == clamp(j + dx, 0, W-1)
        src_col = jnp.clip(
            jax.lax.broadcasted_iota(jnp.int32, (1, W), 1) + dx, 0, W - 1)
        k_col = jax.lax.broadcasted_iota(jnp.int32, (W, 1), 0)
        pcol_t = (k_col == src_col).astype(jnp.float32)          # (W, W)
        #   Prow[i, k] = 1 iff k == clamp(i + dy, 0, H-1)
        src_row = jnp.clip(
            jax.lax.broadcasted_iota(jnp.int32, (H, 1), 0) + dy, 0, H - 1)
        k_row = jax.lax.broadcasted_iota(jnp.int32, (1, H), 1)
        prow = (src_row == k_row).astype(jnp.float32)             # (H, H)

        # Cast fused into the kernel (replaces the wrapper-level x.float()).
        # f32 operands also keep the MXU path legal on v7x for integer inputs.
        x = x_ref[g].astype(jnp.float32)                          # (C, H, W)

        if H % 8 == 0:
            # Column select for ALL channels in one MXU matmul: (C*H, W)@(W, W).
            y = jnp.dot(x.reshape(C * H, W), pcol_t,
                        preferred_element_type=jnp.float32).reshape(C, H, W)
            for c in range(C):                                    # row select
                o_ref[g, c] = jnp.dot(prow, y[c],
                                      preferred_element_type=jnp.float32)
        else:
            # Sublane-unfriendly H: keep everything per-channel (no reshape).
            for c in range(C):
                yc = jnp.dot(x[c], pcol_t, preferred_element_type=jnp.float32)
                o_ref[g, c] = jnp.dot(prow, yc,
                                      preferred_element_type=jnp.float32)


def random_shifts_aug(x, shifts, pad, *, images_per_step=None):
    """Pallas equivalent of RandomShiftsAug(pad).forward(x).

    x:      (N, C, H, W) in its NATIVE dtype (uint8 / bf16 / f32, ...); the
            float cast happens inside the kernel.  Output is float32.
    shifts: (N, 2) integer shifts in [0, 2*pad]
            (== torch.randint draw; [:, 0] -> width/x shift, [:, 1] -> height/y).
    """
    N, C, H, W = x.shape
    assert H == W
    shifts_flat = shifts.astype(jnp.int32).reshape(-1)   # (2*N,) for SMEM

    # Images per grid step: target a few MiB of payload per step (amortizes the
    # ~0.35us/step pipeline overhead and approaches HBM roofline), keep >= 2
    # grid steps when possible (v7x has 2 TensorCores sharding the "parallel"
    # axis), and require G | N so blocks stay rectangular.
    if images_per_step is None:
        per_img_bytes = C * H * W * (x.dtype.itemsize + 4)   # in + f32 out
        g_cap = max(1, (4 << 20) // per_img_bytes)           # ~4 MiB / step
        if N >= 2:
            g_cap = min(g_cap, N // 2)
        G = 1
        for d in range(1, N + 1):
            if N % d == 0 and d <= g_cap:
                G = d
    else:
        G = images_per_step
        assert N % G == 0
    grid = (N // G,)

    # VMEM budget: 2x (double-buffered) x (in block + out block) + margin;
    # capped at 48 MiB so it stays within v7x's 64 MiB physical VMEM.
    block_bytes = G * C * H * W * (x.dtype.itemsize + 4)
    vmem_limit = int(min(max(4 * block_bytes + (2 << 20), 16 << 20), 48 << 20))

    kernel = functools.partial(_shift_kernel, pad=pad, images_per_step=G)
    grid_spec = pltpu.PrefetchScalarGridSpec(
        num_scalar_prefetch=1,
        grid=grid,
        # NOTE: sweep pipeline_mode=pl.Buffered(3) on the input spec if the
        # profile still shows exposed DMA after batching.
        in_specs=[pl.BlockSpec((G, C, H, W), lambda n, s: (n, 0, 0, 0))],
        out_specs=pl.BlockSpec((G, C, H, W), lambda n, s: (n, 0, 0, 0)),
    )
    return pl.pallas_call(
        kernel,
        grid_spec=grid_spec,
        out_shape=jax.ShapeDtypeStruct((N, C, H, W), jnp.float32),
        compiler_params=pltpu.CompilerParams(
            dimension_semantics=("parallel",),
            vmem_limit_bytes=vmem_limit),
    )(shifts_flat, x)


if __name__ == "__main__":
    pad = 4
    N, C, H, W = 2, 4, 16, 16

    key = jax.random.PRNGKey(0)
    kx, ks = jax.random.split(key)
    # Native (non-f32) input to exercise the in-kernel fused cast.
    x = jax.random.normal(kx, (N, C, H, W), dtype=jnp.float32).astype(jnp.bfloat16)
    # torch.randint(0, 2*pad + 1, size=(n, 1, 1, 2)) -> ints in [0, 2*pad]
    # TODO(synk): shift sampling itself (torch RNG) is done outside the kernel.
    shifts = jax.random.randint(ks, (N, 2), 0, 2 * pad + 1, dtype=jnp.int32)

    out = jax.block_until_ready(random_shifts_aug(x, shifts, pad))

    # Pure-JAX reference: replicate-pad + integer crop (exactly what
    # grid_sample computes here, up to float rounding of the linspace grid).
    xp = jnp.pad(x, ((0, 0), (0, 0), (pad, pad), (pad, pad)), mode="edge")
    ref = jnp.stack([
        jax.lax.dynamic_slice(
            xp[n], (0, int(shifts[n, 1]), int(shifts[n, 0])), (C, H, W))
        for n in range(N)
    ]).astype(jnp.float32)

    assert out.shape == (N, C, H, W) and out.dtype == jnp.float32
    assert jnp.allclose(out, ref, atol=1e-5), "mismatch vs reference"
    print("KERNEL_OK")
</pallas_src>

<mosaic_0001>
module attributes {stable_mosaic.version = 11 : i64} {
  func.func @_shift_kernel(%arg0: i32, %arg1: memref<4xi32, #tpu.memory_space<smem>>, %arg2: memref<1x4x16x16xbf16, #tpu.memory_space<vmem>>, %arg3: memref<1x4x16x16xf32, #tpu.memory_space<vmem>>) attributes {dimension_semantics = [#tpu.dimension_semantics<parallel>], iteration_bounds = array<i64: 2>, scalar_prefetch = 1 : i64, scratch_operands = 0 : i64, tpu.core_type = #tpu.core_type<tc>, window_params = [{transform_indices = @transform_0, window_bounds = array<i64: 1, 4, 16, 16>}, {transform_indices = @transform_1, window_bounds = array<i64: 1, 4, 16, 16>}]} {
    %c1_i32 = arith.constant 1 : i32
    %0 = arith.muli %arg0, %c1_i32 : i32
    %c0_i32 = arith.constant 0 : i32
    %1 = arith.addi %0, %c0_i32 : i32
    %c2_i32 = arith.constant 2 : i32
    %2 = arith.muli %c2_i32, %1 : i32
    %3 = arith.index_cast %2 : i32 to index
    %4 = memref.load %arg1[%3] : memref<4xi32, #tpu.memory_space<smem>>
    %c2_i32_0 = arith.constant 2 : i32
    %5 = arith.muli %c2_i32_0, %1 : i32
    %c1_i32_1 = arith.constant 1 : i32
    %6 = arith.addi %5, %c1_i32_1 : i32
    %7 = arith.index_cast %6 : i32 to index
    %8 = memref.load %arg1[%7] : memref<4xi32, #tpu.memory_space<smem>>
    %c4_i32 = arith.constant 4 : i32
    %9 = arith.subi %4, %c4_i32 : i32
    %c4_i32_2 = arith.constant 4 : i32
    %10 = arith.subi %8, %c4_i32_2 : i32
    %11 = tpu.iota {dimensions = array<i32: 1>} : vector<1x16xi32>
    %12 = vector.broadcast %9 : i32 to vector<1x16xi32>
    %13 = arith.addi %11, %12 : vector<1x16xi32>
    %c0_i32_3 = arith.constant 0 : i32
    %c15_i32 = arith.constant 15 : i32
    %14 = vector.broadcast %c0_i32_3 : i32 to vector<1x16xi32>
    %15 = arith.maxsi %14, %13 : vector<1x16xi32>
    %16 = vector.broadcast %c15_i32 : i32 to vector<1x16xi32>
    %17 = arith.minsi %16, %15 : vector<1x16xi32>
    %18 = tpu.iota {dimensions = array<i32: 0>} : vector<16x1xi32>
    %19 = vector.broadcast %18 : vector<16x1xi32> to vector<16x16xi32>
    %20 = vector.broadcast %17 : vector<1x16xi32> to vector<16x16xi32>
    %21 = arith.cmpi eq, %19, %20 : vector<16x16xi32>
    %22 = arith.extui %21 : vector<16x16xi1> to vector<16x16xi32>
    %23 = arith.sitofp %22 : vector<16x16xi32> to vector<16x16xf32>
    %24 = tpu.iota {dimensions = array<i32: 0>} : vector<16x1xi32>
    %25 = vector.broadcast %10 : i32 to vector<16x1xi32>
    %26 = arith.addi %24, %25 : vector<16x1xi32>
    %c0_i32_4 = arith.constant 0 : i32
    %c15_i32_5 = arith.constant 15 : i32
    %27 = vector.broadcast %c0_i32_4 : i32 to vector<16x1xi32>
    %28 = arith.maxsi %27, %26 : vector<16x1xi32>
    %29 = vector.broadcast %c15_i32_5 : i32 to vector<16x1xi32>
    %30 = arith.minsi %29, %28 : vector<16x1xi32>
    %31 = tpu.iota {dimensions = array<i32: 1>} : vector<1x16xi32>
    %32 = vector.broadcast %30 : vector<16x1xi32> to vector<16x16xi32>
    %33 = vector.broadcast %31 : vector<1x16xi32> to vector<16x16xi32>
    %34 = arith.cmpi eq, %32, %33 : vector<16x16xi32>
    %35 = arith.extui %34 : vector<16x16xi1> to vector<16x16xi32>
    %36 = arith.sitofp %35 : vector<16x16xi32> to vector<16x16xf32>
    %c0 = arith.constant 0 : index
    %c0_6 = arith.constant 0 : index
    %c0_7 = arith.constant 0 : index
    %c0_8 = arith.constant 0 : index
    %37 = vector.load %arg2[%c0, %c0_6, %c0_7, %c0_8] : memref<1x4x16x16xbf16, #tpu.memory_space<vmem>>, vector<1x4x16x16xbf16>
    %38 = vector.shape_cast %37 : vector<1x4x16x16xbf16> to vector<4x16x16xbf16>
    %39 = arith.extf %38 : vector<4x16x16xbf16> to vector<4x16x16xf32>
    %40 = vector.shape_cast %39 : vector<4x16x16xf32> to vector<64x16xf32>
    %cst = arith.constant dense<0.000000e+00> : vector<64x16xf32>
    %41 = tpu.matmul %40, %23, %cst {dimension_numbers = #tpu.dot_dimension_numbers<[1], [0], [0], [1], [0, 0, 1, 1], [], []>} : vector<64x16xf32>, vector<16x16xf32>, vector<64x16xf32> -> vector<64x16xf32>
    %42 = vector.shape_cast %41 : vector<64x16xf32> to vector<4x16x16xf32>
    %43 = vector.extract_strided_slice %42 {offsets = [0, 0, 0], sizes = [1, 16, 16], strides = [1, 1, 1]} : vector<4x16x16xf32> to vector<1x16x16xf32>
    %44 = vector.shape_cast %43 : vector<1x16x16xf32> to vector<16x16xf32>
    %cst_9 = arith.constant dense<0.000000e+00> : vector<16x16xf32>
    %45 = tpu.matmul %36, %44, %cst_9 {dimension_numbers = #tpu.dot_dimension_numbers<[1], [0], [0], [1], [0, 0, 1, 1], [], []>} : vector<16x16xf32>, vector<16x16xf32>, vector<16x16xf32> -> vector<16x16xf32>
    %c0_10 = arith.constant 0 : index
    %c0_11 = arith.constant 0 : index
    %c0_12 = arith.constant 0 : index
    %c0_13 = arith.constant 0 : index
    %46 = vector.load %arg3[%c0_10, %c0_11, %c0_12, %c0_13] : memref<1x4x16x16xf32, #tpu.memory_space<vmem>>, vector<1x1x16x16xf32>
    %47 = vector.shape_cast %46 : vector<1x1x16x16xf32> to vector<16x16xf32>
    %48 = vector.shape_cast %45 : vector<16x16xf32> to vector<1x1x16x16xf32>
    tpu.vector_store %arg3[%c0_10, %c0_11, %c0_12, %c0_13], %48 {strides = array<i32>} : memref<1x4x16x16xf32, #tpu.memory_space<vmem>>, vector<1x1x16x16xf32>,
    %49 = vector.extract_strided_slice %42 {offsets = [1, 0, 0], sizes = [1, 16, 16], strides = [1, 1, 1]} : vector<4x16x16xf32> to vector<1x16x16xf32>
    %50 = vector.shape_cast %49 : vector<1x16x16xf32> to vector<16x16xf32>
    %cst_14 = arith.constant dense<0.000000e+00> : vector<16x16xf32>
    %51 = tpu.matmul %36, %50, %cst_14 {dimension_numbers = #tpu.dot_dimension_numbers<[1], [0], [0], [1], [0, 0, 1, 1], [], []>} : vector<16x16xf32>, vector<16x16xf32>, vector<16x16xf32> -> vector<16x16xf32>
    %c0_15 = arith.constant 0 : index
    %c1 = arith.constant 1 : index
    %c0_16 = arith.constant 0 : index
    %c0_17 = arith.constant 0 : index
    %52 = vector.load %arg3[%c0_15, %c1, %c0_16, %c0_17] : memref<1x4x16x16xf32, #tpu.memory_space<vmem>>, vector<1x1x16x16xf32>
    %53 = vector.shape_cast %52 : vector<1x1x16x16xf32> to vector<16x16xf32>
    %54 = vector.shape_cast %51 : vector<16x16xf32> to vector<1x1x16x16xf32>
    tpu.vector_store %arg3[%c0_15, %c1, %c0_16, %c0_17], %54 {strides = array<i32>} : memref<1x4x16x16xf32, #tpu.memory_space<vmem>>, vector<1x1x16x16xf32>,
    %55 = vector.extract_strided_slice %42 {offsets = [2, 0, 0], sizes = [1, 16, 16], strides = [1, 1, 1]} : vector<4x16x16xf32> to vector<1x16x16xf32>
    %56 = vector.shape_cast %55 : vector<1x16x16xf32> to vector<16x16xf32>
    %cst_18 = arith.constant dense<0.000000e+00> : vector<16x16xf32>
    %57 = tpu.matmul %36, %56, %cst_18 {dimension_numbers = #tpu.dot_dimension_numbers<[1], [0], [0], [1], [0, 0, 1, 1], [], []>} : vector<16x16xf32>, vector<16x16xf32>, vector<16x16xf32> -> vector<16x16xf32>
    %c0_19 = arith.constant 0 : index
    %c2 = arith.constant 2 : index
    %c0_20 = arith.constant 0 : index
    %c0_21 = arith.constant 0 : index
    %58 = vector.load %arg3[%c0_19, %c2, %c0_20, %c0_21] : memref<1x4x16x16xf32, #tpu.memory_space<vmem>>, vector<1x1x16x16xf32>
    %59 = vector.shape_cast %58 : vector<1x1x16x16xf32> to vector<16x16xf32>
    %60 = vector.shape_cast %57 : vector<16x16xf32> to vector<1x1x16x16xf32>
    tpu.vector_store %arg3[%c0_19, %c2, %c0_20, %c0_21], %60 {strides = array<i32>} : memref<1x4x16x16xf32, #tpu.memory_space<vmem>>, vector<1x1x16x16xf32>,
    %61 = vector.extract_strided_slice %42 {offsets = [3, 0, 0], sizes = [1, 16, 16], strides = [1, 1, 1]} : vector<4x16x16xf32> to vector<1x16x16xf32>
    %62 = vector.shape_cast %61 : vector<1x16x16xf32> to vector<16x16xf32>
    %cst_22 = arith.constant dense<0.000000e+00> : vector<16x16xf32>
    %63 = tpu.matmul %36, %62, %cst_22 {dimension_numbers = #tpu.dot_dimension_numbers<[1], [0], [0], [1], [0, 0, 1, 1], [], []>} : vector<16x16xf32>, vector<16x16xf32>, vector<16x16xf32> -> vector<16x16xf32>
    %c0_23 = arith.constant 0 : index
    %c3 = arith.constant 3 : index
    %c0_24 = arith.constant 0 : index
    %c0_25 = arith.constant 0 : index
    %64 = vector.load %arg3[%c0_23, %c3, %c0_24, %c0_25] : memref<1x4x16x16xf32, #tpu.memory_space<vmem>>, vector<1x1x16x16xf32>
    %65 = vector.shape_cast %64 : vector<1x1x16x16xf32> to vector<16x16xf32>
    %66 = vector.shape_cast %63 : vector<16x16xf32> to vector<1x1x16x16xf32>
    tpu.vector_store %arg3[%c0_23, %c3, %c0_24, %c0_25], %66 {strides = array<i32>} : memref<1x4x16x16xf32, #tpu.memory_space<vmem>>, vector<1x1x16x16xf32>,
    return
  }
  func.func @transform_0(%arg0: i32, %arg1: memref<4xi32, #tpu.memory_space<smem>>) -> (i32, i32, i32, i32) {
    %c0_i32 = arith.constant 0 : i32
    %c0_i32_0 = arith.constant 0 : i32
    %c0_i32_1 = arith.constant 0 : i32
    %c0_i32_2 = arith.constant 0 : i32
    return %arg0, %c0_i32, %c0_i32_0, %c0_i32_1 : i32, i32, i32, i32
  }
  func.func @transform_1(%arg0: i32, %arg1: memref<4xi32, #tpu.memory_space<smem>>) -> (i32, i32, i32, i32) {
    %c0_i32 = arith.constant 0 : i32
    %c0_i32_0 = arith.constant 0 : i32
    %c0_i32_1 = arith.constant 0 : i32
    %c0_i32_2 = arith.constant 0 : i32
    return %arg0, %c0_i32, %c0_i32_0, %c0_i32_1 : i32, i32, i32, i32
  }
}

</mosaic_0001>

<bundles_post_ra>
// kernel: tpu_custom_call.1
= control target key start
LH: loop header
LB: loop body
LE: loop exit
PB: predicated region body
PF: predicated region fallthrough
CT: control target
= control target key end

     0   :  { %s1279_s0 = inlined_call_operand.hbm [shape: s32[4], index: 0, kind: input, shape index: {}]   ;;  %s1280_s1 = inlined_call_operand.hbm [shape: bf16[2,4,16,16], index: 1, kind: input, shape index: {}]   ;;  %s1281_s2 = inlined_call_operand.hbm [shape: f32[2,4,16,16], index: 2, kind: output, shape index: {}]  }
   0x1   :  { %s939_s11 = scalar_lea.hbm %s1279_s0, 16 }
   0x2   :  { %p940_p0 = scmp.ne.s32.totalorder %s1279_s0, %s939_s11  ;;  %p943_p1 = scmp.lt.u32.totalorder %s939_s11, %s1279_s0 }
   0x4   :  { %p945_p2 = pnand %p943_p1, %p940_p0 }
   0x6   :  { %948 = shalt.err (!%p945_p2)  }
   0x7   :  { %s1049_s16 = smov [#allocation3]  }
   0x8   :  { %8 = dma.hbm_to_smem %s1279_s0, 16, %s1049_s16, [#allocation2] }
   0x9   :  { %1023 = dma.done.wait [#allocation2], 16 }
   0xa   :  { %1024 = vsyncadd [#allocation2], 4294967280 }
   0xb   :  { %10 = sfence }
   0xc   :  { %11 = vsyncpa [#allocation5], 0 }
   0xd   :  { %13 = vsyncpa [#allocation5 + $0x1], 0 }
   0xe   :  { %14 = vsyncpa [#allocation6], 0 }
   0xf   :  { %16 = vsyncpa [#allocation6 + $0x1], 0  ;;  %s1085_s19 = smov 0   ;;  %s1087_s20 = smov 0  }
  0x10   :  { %s1089_s21 = smov 0   ;;  %s1091_s22 = smov 0  }
  0x11 LB: > { %s1106_s0 = sadd.s32 4294967295, %s1047_s22   ;;  %s730_s23 = sadd.s32 4294967294, %s1047_s22   ;;  %s1047_s22 = sphi %s1091_s22, %s1294_s22   ;;  %s1043_s21 = sphi %s1089_s21, %s1293_s21   ;;  %s1039_s20 = sphi %s1087_s20, %s1292_s20   ;;  %s1035_s19 = sphi %s1085_s19, %s1291_s19  }
  0x12   : > { %s1110_s24 = sadd.s32 1, %s1047_s22   ;;  %s29_s25 = sadd.s32 1, %s1043_s21 }
  0x13   : > { %s26_s26 = ssub.s32 %s1047_s22, %s1110_s24  ;;  %p36_p3 = scmp.ne.s32.totalorder %s1043_s21, %s1039_s20 }
  0x14   : > { %p27_p4 = scmp.eq.s32.totalorder %s26_s26, 0  ;;  %p37_p5 = scmp.eq.s32.totalorder %s1047_s22, 0 }
  0x15   : > { %p42_p6 = scmp.ne.s32.totalorder %s1039_s20, %s1035_s19  ;;  %p43_p7 = scmp.eq.s32.totalorder %s1106_s0, 0 }
  0x16   : > { %s1122_s27 = scalar_select %p27_p4, %s1043_s21, %s29_s25  }
  0x17   : > { %p1124_p8 = por %p37_p5, %p36_p3  ;;  %p1128_p9 = por %p43_p7, %p42_p6 }
  0x18   : > { %p66_p10 = scmp.eq.s32.totalorder %s1106_s0, 1  ;;  %p72_p11 = scmp.eq.s32.totalorder %s730_s23, 1 }
  0x19   : > { %p898_p13 = scmp.lt.s32.totalorder %s1047_s22, 2  ;;  %s92_s4 = sand.u32 1, %s1043_s21  }
  0x1a   : > { %p1135_p0 = por %p66_p10, %p36_p3  ;;  %p1139_p1 = por %p72_p11, %p42_p6 }
  0x1b   : > { %s775_s5 = sshll.u32 %s1047_s22, 9  ;;  %s733_s6 = sshll.u32 %s92_s4, 5 }
  0x1c   : > { %s1285_s30 = scalar_select %p1135_p0, 1, 0 }
  0x1d   : > { %s1286_s3 = scalar_select %p1139_p1, 1, 0 }
  0x1e   : > { %s1148_s9 = scalar_lea.hbm %s1280_s1, %s775_s5  ;;  %s96_s10 = scalar_lea.vmem [#allocation4], %s733_s6 }
  0x1f   : > { %s103_s11 = sshll.u32 %s96_s10, 4  ;;  %p1152_p2 = pnand %p898_p13, %p1124_p8  ;;  %s1156_s11 = int_to_ptr.vmem [resolvable:$true] %s103_s11 }
  0x20   : > { %s1158_s13 = scalar_lea.sflag [#allocation5], %s92_s4  ;;  %s949_s14 = scalar_lea.hbm %s1148_s9, 512 }
  0x21   : > { %p950_p3 = scmp.ne.s32.totalorder %s1148_s9, %s949_s14  ;;  %p951_p4 = pneg %p1152_p2 }
  0x22   : > { %s954_s17 = scalar_lea.hbm %s1280_s1, 1024  ;;  %p955_p7 = scmp.lt.u32.totalorder %s1148_s9, %s1280_s1 }
  0x23   : > { %p952_p5 = pnand %p951_p4, %p950_p3  ;;  %p956_p8 = scmp.lt.u32.totalorder %s954_s17, %s949_s14 }
  0x24   : > { %p958_p11 = scmp.lt.u32.totalorder %s949_s14, %s1148_s9 }
  0x25   : > { %p953_p6 = pneg %p952_p5  ;;  %p957_p10 = por %p956_p8, %p955_p7 }
  0x27   : > { %p959_p13 = por %p958_p11, %p957_p10 }
  0x29   : > { %p960_p12 = pnand %p959_p13, %p953_p6 }
  0x2b   : > { %963 = shalt.err (!%p960_p12)
}
  0x2c   : > { %s964_s25 = scalar_lea.vmem %s1156_s11, 512  ;;  %s1050_s26 = smov [#allocation4]  }
  0x2d   : > { %p965_p3 = scmp.ne.s32.totalorder %s1156_s11, %s964_s25  ;;  %s969_s28 = sshll.u32 %s1050_s26, 4  ;;  %s970_s28 = int_to_ptr.vmem [resolvable:$false] %s969_s28 }
  0x2e   : > { %s971_s4 = scalar_lea.vmem %s970_s28, 1024  ;;  %p972_p0 = scmp.lt.s32.totalorder %s1156_s11, %s970_s28 }
  0x2f   : > { %p967_p5 = pnand %p965_p3, %p951_p4  ;;  %p973_p7 = scmp.lt.s32.totalorder %s971_s4, %s964_s25 }
  0x31   : > { %p968_p1 = pneg %p967_p5  ;;  %p974_p8 = por %p973_p7, %p972_p0 }
  0x33   : > { %p975_p10 = pnand %p974_p8, %p968_p1 }
  0x35   : > { %978 = shalt.err (!%p975_p10)
}
  0x36   : > { %s1051_s5 = smov 64   ;;  %s1052_s6 = smov 4  }
  0x37   : > { %893 = dma.hbm_to_vmem [thread:$0]  (!%p1152_p2), %s1148_s9, 512, %s1156_s11, %s1158_s13, %s1051_s5, %s1051_s5, %s1052_s6  }
  0x38   : > { %p736_p12 = scmp.ge.s32.totalorder %s1047_s22, 1  ;;  %p111_p4 = scmp.lt.s32.totalorder %s1047_s22, 3 }
  0x3a   : > { %p112_p6 = pnand %p736_p12, %p111_p4 }
  0x3b   : > { %s1189_s7 = sand.u32 (!%p112_p6), 1, %s1039_s20  }
  0x3c   : > { %115 = sbr.rel (%p112_p6) target bundleno = 548 (0x224), region = 24  ;;  %s737_s8 = sshll.u32 (!%p112_p6), %s1189_s7, 5 }
  0x3d   : > { %s118_s10 = scalar_lea.sflag (!%p112_p6), [#allocation5], %s1189_s7  ;;  %s1193_s14 = scalar_lea.vmem (!%p112_p6), [#allocation4], %s737_s8 }
  0x43   : > { %1026 = dma.done.wait (%p1128_p9), %s118_s10, 512  }
  0x44   : > { %1028 = vsyncadd (%p1128_p9), %s118_s10, 4294966784  ;;  %s739_s9 = sshll.u32 %s1106_s0, 1  ;;  %v146_v0 = vlaneseq  ;;  %v778_v3 = vld [vmem:[%s1193_s14] sm:$0xff]   ;;  %vm196_vm0 = vcmask 130048   ;;  %v793_v13 = vld [vmem:[%s1193_s14 + $0x8] sm:$0xff]   ;;  %v1054_v28 = vmov 0.0  }
  0x45   : > { %s141_s11 = sld [smem:[#allocation3 + %s739_s9]]  ;;  %s142_s12 = sadd.s32 1, %s739_s9  ;;  %v779_v6 = vunpack.c.l.bf16 %v778_v3  ;;  %v1053_v14 = vmov 1.0|1.0   ;;  %v780_v15 = vunpack.c.h.bf16 %v778_v3  ;;  %v783_v16 = vunpack.c.l.bf16 %v793_v13  ;;  %v794_v17 = vld [vmem:[%s1193_s14 + $0x10] sm:$0xff]   ;;  %v795_v20 = vld [vmem:[%s1193_s14 + $0x18] sm:$0xff]  }
  0x46   : > { %s143_s13 = sld [smem:[#allocation3 + %s142_s12]]  ;;  %v155_v1 = vshrl.u32 %v146_v0, 7  ;;  %v147_v2 = vand.u32 127, %v146_v0  ;;  %v784_v18 = vunpack.c.h.bf16 %v793_v13  ;;  %v787_v19 = vunpack.c.l.bf16 %v794_v17  ;;  %s738_s29 = sshll.u32 %s1189_s7, 6 }
  0x47   : > { %826 = vmatprep.mubr.msk.f32.mxu0 %vm196_vm0, %v779_v6  ;;  %v788_v21 = vunpack.c.h.bf16 %v794_v17  ;;  %v791_v22 = vunpack.c.l.bf16 %v795_v20  ;;  %v792_v23 = vunpack.c.h.bf16 %v795_v20  ;;  %s139_s17 = scalar_lea.vmem [#allocation7], %s738_s29  ;;  %s776_s23 = sshll.u32 %s1106_s0, 10 }
  0x48   : > { %v156_v5 = vadd.s32 8, %v155_v1  ;;  %s657_s18 = sshll.u32 %s139_s17, 4  ;;  %s1233_s28 = scalar_lea.hbm %s1281_s2, %s776_s23  ;;  %s1227_s18 = int_to_ptr.vmem [resolvable:$true] %s657_s18 }
  0x49   : > { %s644_s0 = scalar_lea.sflag [#allocation6], %s1189_s7  ;;  %s979_s4 = scalar_lea.vmem %s1227_s18, 1024 }
  0x4a   : > { %p980_p9 = scmp.ne.s32.totalorder %s1227_s18, %s979_s4  ;;  %p1288_p0 = scmp.ne.s32.totalorder %s1285_s30, 0 }
  0x4b   : > { %s740_s15 = sadd.s32 4294967292, %s141_s11  ;;  %s1055_s5 = smov [#allocation7]  }
  0x4c   : > { %s741_s16 = sadd.s32 4294967292, %s143_s13  ;;  %v148_v4 = vstv %s740_s15  ;;  %p981_p1 = pnand %p980_p9, %p1288_p0 }
  0x4d   : > { %v149_v7 = vadd.s32 %v148_v4, %v147_v2  ;;  %v163_v8 = vstv %s741_s16  ;;  %s983_s6 = sshll.u32 %s1055_s5, 4  ;;  %s984_s6 = int_to_ptr.vmem [resolvable:$false] %s983_s6 }
  0x4e   : > { %v164_v9 = vadd.s32 %v163_v8, %v155_v1  ;;  %v165_v10 = vadd.s32 %v163_v8, %v156_v5  ;;  %p982_p2 = pneg %p981_p1  ;;  %s985_s8 = scalar_lea.vmem %s984_s6, 2048 }
  0x4f   : > { %vm150_vm1 = vcmp.gt.s32.totalorder %v149_v7, 0  ;;  %p986_p11 = scmp.lt.s32.totalorder %s1227_s18, %s984_s6  ;;  %p987_p13 = scmp.lt.s32.totalorder %s985_s8, %s979_s4 }
  0x50   : > { %v151_v11 = vsel %vm150_vm1, %v149_v7, 0  ;;  %vm166_vm6 = vcmp.gt.s32.totalorder %v164_v9, 0  ;;  %vm168_vm7 = vcmp.gt.s32.totalorder %v165_v10, 0 }
  0x51   : > { %vm152_vm2 = vcmp.lt.s32.totalorder %v151_v11, 15  ;;  %v167_v24 = vsel %vm166_vm6, %v164_v9, 0  ;;  %v169_v25 = vsel %vm168_vm7, %v165_v10, 0  ;;  %p988_p3 = por %p987_p13, %p986_p11 }
  0x52   : > { %v153_v12 = vsel %vm152_vm2, %v151_v11, 15  ;;  %vm170_vm8 = vcmp.lt.s32.totalorder %v167_v24, 15  ;;  %vm172_vm9 = vcmp.lt.s32.totalorder %v169_v25, 15 }
  0x53   : > { %vm157_vm3 = vcmp.eq.s32.totalorder %v155_v1, %v153_v12  ;;  %vm158_vm4 = vcmp.eq.s32.totalorder %v156_v5, %v153_v12  ;;  %v171_v26 = vsel %vm170_vm8, %v167_v24, 15  ;;  %v173_v27 = vsel %vm172_vm9, %v169_v25, 15  ;;  %p989_p5 = pnand %p988_p3, %p982_p2 }
  0x54   : > { %vm866_vm5 = vmpackc.low %vm158_vm4, %vm157_vm3  ;;  %vm174_vm10 = vcmp.eq.s32.totalorder %v171_v26, %v147_v2  ;;  %vm175_vm11 = vcmp.eq.s32.totalorder %v173_v27, %v147_v2 }
  0x55   : > { %867 = vmatprep.subr.msk.bf16.mxu0 %vm866_vm5, %v1053_v14  ;;  %v744_v29 = vsel %vm174_vm10, 1.0, %v1054_v28  ;;  %v745_v30 = vsel %vm175_vm11, 1.0, %v1054_v28 }
  0x56   : > { %869 = vmatpush3.bf16.msk.msra.mxu0 %vm866_vm5, %v1053_v14  ;;  %842 = vmatprep.mubr.msk.f32.mxu1 %vm196_vm0, %v744_v29 }
  0x59   : > { %827 = vmatmul.mubr.msk.f32.vlgmr.msra.gmra.mrb[0].mxu0 %vm196_vm0, %v780_v15 }
  0x5a   : > { %829 = vmatprep.mubr.msk.f32.mxu0 %vm196_vm0, %v783_v16 }
  0x5d   : > { %830 = vmatmul.mubr.msk.f32.gmra.mrb[2].mxu0 %vm196_vm0, %v784_v18 }
  0x5e   : > { %832 = vmatprep.mubr.msk.f32.mxu0 %vm196_vm0, %v787_v19 }
  0x61   : > { %833 = vmatmul.mubr.msk.f32.gmra.mrb[4].mxu0 %vm196_vm0, %v788_v21 }
  0x62   : > { %835 = vmatprep.mubr.msk.f32.mxu0 %vm196_vm0, %v791_v22 }
  0x65   : > { %836 = vmatmul.mubr.msk.f32.gmra.mrb[6].mxu0 %vm196_vm0, %v792_v23 }
 0x12c   : > { %v828_v31 = vpop.f32.mrb[0].mxu0 }
 0x12d   : > { %v287_v32 = vpop.f32.mrb[1].mxu0 }
 0x12e   : > { %v870_v33 = vpack.c.bf16 %v828_v31, %v287_v32 }
 0x130   : > { %v831_v34 = vpop.f32.mrb[2].mxu0  ;;  %871 = vmatprep.subr.bf16.mxu1 %v870_v33 }
 0x131   : > { %v297_v35 = vpop.f32.mrb[3].mxu0  ;;  %873 = vmatpush3.bf16.msra.mxu1 %v870_v33 }
 0x132   : > { %v874_v36 = vpack.c.bf16 %v831_v34, %v297_v35 }
 0x134   : > { %v834_v37 = vpop.f32.mrb[4].mxu0  ;;  %843 = vmatmul.mubr.msk.f32.vlgmr.msra.gmra.mrb[0].mxu1 %vm196_vm0, %v745_v30  ;;  %875 = vmatprep.subr.bf16.mxu1 %v874_v36 }
 0x135   : > { %v307_v38 = vpop.f32.mrb[5].mxu0  ;;  %877 = vmatpush3.bf16.msra.mxu1 %v874_v36  ;;  %849 = vmatprep.mubr.msk.f32.mxu1 %vm196_vm0, %v744_v29 }
 0x136   : > { %v878_v39 = vpack.c.bf16 %v834_v37, %v307_v38 }
 0x138   : > { %v837_v40 = vpop.f32.mrb[6].mxu0  ;;  %850 = vmatmul.mubr.msk.f32.vlgmr.msra.gmra.mrb[2].mxu1 %vm196_vm0, %v745_v30  ;;  %879 = vmatprep.subr.bf16.mxu1 %v878_v39 }
 0x139   : > { %v317_v41 = vpop.f32.mrb[7].mxu0  ;;  %881 = vmatpush3.bf16.msra.mxu1 %v878_v39  ;;  %856 = vmatprep.mubr.msk.f32.mxu1 %vm196_vm0, %v744_v29 }
 0x13a   : > { %v882_v42 = vpack.c.bf16 %v837_v40, %v317_v41 }
 0x13c   : > { %857 = vmatmul.mubr.msk.f32.vlgmr.msra.gmra.mrb[4].mxu1 %vm196_vm0, %v745_v30  ;;  %883 = vmatprep.subr.bf16.mxu1 %v882_v42 }
 0x13d   : > { %885 = vmatpush3.bf16.msra.mxu1 %v882_v42  ;;  %863 = vmatprep.mubr.msk.f32.mxu1 %vm196_vm0, %v744_v29 }
 0x140   : > { %864 = vmatmul.mubr.msk.f32.vlgmr.msra.gmra.mrb[6].mxu1 %vm196_vm0, %v745_v30 }
 0x207   : > { %v844_v43 = vpop.f32.mrb[0].mxu1 }
 0x208   : > { %408 = vst.msk [vmem:[%s139_s17 + $0x8] sm:$0xff] %vm196_vm0, %v844_v43  ;;  %v398_v44 = vpop.f32.mrb[1].mxu1 }
 0x209   : > { %407 = vst.msk [vmem:[%s139_s17] sm:$0xff] %vm196_vm0, %v398_v44 }
 0x20b   : > { %v851_v45 = vpop.f32.mrb[2].mxu1 }
 0x20c   : > { %761 = vst.msk [vmem:[%s139_s17 + $0x18] sm:$0xff] %vm196_vm0, %v851_v45  ;;  %v475_v46 = vpop.f32.mrb[3].mxu1 }
 0x20d   : > { %760 = vst.msk [vmem:[%s139_s17 + $0x10] sm:$0xff] %vm196_vm0, %v475_v46 }
 0x20f   : > { %v858_v47 = vpop.f32.mrb[4].mxu1 }
 0x210   : > { %765 = vst.msk [vmem:[%s139_s17 + $0x28] sm:$0xff] %vm196_vm0, %v858_v47  ;;  %v553_v48 = vpop.f32.mrb[5].mxu1 }
 0x211   : > { %764 = vst.msk [vmem:[%s139_s17 + $0x20] sm:$0xff] %vm196_vm0, %v553_v48 }
 0x213   : > { %v865_v49 = vpop.f32.mrb[6].mxu1 }
 0x214   : > { %769 = vst.msk [vmem:[%s139_s17 + $0x38] sm:$0xff] %vm196_vm0, %v865_v49  ;;  %v631_v50 = vpop.f32.mrb[7].mxu1 }
 0x215   : > { %768 = vst.msk [vmem:[%s139_s17 + $0x30] sm:$0xff] %vm196_vm0, %v631_v50 }
 0x216   : > { %992 = shalt.err (!%p989_p5)
}
 0x217   : > { %s993_s10 = scalar_lea.hbm %s1233_s28, 1024  ;;  %s997_s11 = scalar_lea.hbm %s1281_s2, 2048 }
 0x218   : > { %p994_p7 = scmp.ne.s32.totalorder %s1233_s28, %s993_s10  ;;  %p998_p12 = scmp.lt.u32.totalorder %s1233_s28, %s1281_s2 }
 0x219   : > { %p999_p4 = scmp.lt.u32.totalorder %s997_s11, %s993_s10  ;;  %p1001_p9 = scmp.lt.u32.totalorder %s993_s10, %s1233_s28 }
 0x21a   : > { %p995_p8 = pnand %p994_p7, %p1288_p0 }
 0x21b   : > { %p1000_p6 = por %p999_p4, %p998_p12 }
 0x21c   : > { %p996_p10 = pneg %p995_p8 }
 0x21d   : > { %p1002_p1 = por %p1001_p9, %p1000_p6 }
 0x21f   : > { %p1003_p2 = pnand %p1002_p1, %p996_p10 }
 0x221   : > { %1006 = shalt.err (!%p1003_p2)
}
 0x222   : > { %s1056_s15 = smov 128   ;;  %s1057_s16 = smov 8  }
 0x223   : > { %888 = dma.vmem_to_hbm [thread:$0]  (%p1288_p0), %s1227_s18, 1024, %s1233_s28, %s644_s0, %s1056_s15, %s1056_s15, %s1057_s16  }
 0x224 PF: > { %s672_s29 = sand.u32 1, %s1035_s19   ;;  %p1289_p11 = scmp.ne.s32.totalorder %s1286_s3, 0 }
 0x225   : > { %p1290_p13 = scmp.ge.s32.totalorder %s1047_s22, 2  ;;  %s673_s17 = scalar_lea.sflag [#allocation6], %s672_s29 }
 0x227   : > { %p895_p3 = pnand %p1290_p13, %p1289_p11 }
 0x229   : > { %1030 = dma.done.wait (!%p895_p3), %s673_s17, 1024  }
 0x22a   : > { %1032 = vsyncadd (!%p895_p3), %s673_s17, 4294966272  ;;  %p19_p5 = scmp.ge.s32.totalorder %s1110_s24, 4   ;;  %s1291_s19 = smov %s1039_s20 }
 0x22b   : > { %s1292_s20 = smov %s1043_s21  ;;  %s1293_s21 = smov %s1122_s27 }
 0x22c   : > { %s1294_s22 = smov %s1110_s24  ;;  %21 = sbr.rel (!%p19_p5) target bundleno = 17 (0x11), region = 72 }
 0x233   :  { %678 = vsyncpa [#allocation5], 1 }
 0x234   :  { %680 = vsyncpa [#allocation5 + $0x1], 1 }
 0x235   :  { %681 = vsyncpa [#allocation6], 1 }
 0x236   :  { %683 = vsyncpa [#allocation6 + $0x1], 1 }

</bundles_post_ra>
